<compile_context>
chip_gen: v5e
topology: v5e:2x2
jax: 0.10.0
libtpu: 0.0.40
codegen_flags: <defaults>
</compile_context>

<pallas_src>
import jax
import jax.numpy as jnp
from jax.experimental import pallas as pl
from jax.experimental.pallas import tpu as pltpu


# Lane-dense last dimension: large multiple of 128.
_LANE = 512
# Target ~2 MiB per block (per-array, per-buffer); VMEM-safe on every gen.
_TARGET_BLOCK_BYTES = 2 * 1024 * 1024


def _relu_kernel(x_ref, o_ref):
    # Single elementwise max per vreg on the VPU; DMA/HBM bandwidth binds.
    o_ref[...] = jnp.maximum(x_ref[...], 0)


def stacked_relu(x: jax.Array) -> jax.Array:
    """Apply ReLU (== StackedReLU([nn.ReLU()]).forward) via a Pallas kernel."""
    orig_shape = x.shape
    dtype = x.dtype
    itemsize = jnp.dtype(dtype).itemsize
    total = x.size

    # Sublane packing factor: 8 for 4-byte, 16 for 2-byte, 32 for 1-byte dtypes.
    sublane = max(8, 32 // itemsize)

    # Row count of the lane-dense slab (pad tail up to a full lane row).
    rows = pl.cdiv(total, _LANE)

    # Block rows: ~2 MiB worth, rounded to the sublane packing factor, but no
    # larger than needed for small inputs (also rounded up to `sublane`).
    max_block_rows = max(sublane,
                         (_TARGET_BLOCK_BYTES // (_LANE * itemsize)) // sublane * sublane)
    block_rows = min(max_block_rows, pl.cdiv(rows, sublane) * sublane)

    # Pad so the grid evenly divides: no data-shape-dependent fallbacks, no
    # masked edge blocks.
    num_blocks = pl.cdiv(rows, block_rows)
    rows_padded = num_blocks * block_rows
    padded_total = rows_padded * _LANE

    x_flat = x.reshape(-1)
    if padded_total != total:
        x_flat = jnp.pad(x_flat, (0, padded_total - total))
    x2d = x_flat.reshape(rows_padded, _LANE)

    out2d = pl.pallas_call(
        _relu_kernel,
        out_shape=jax.ShapeDtypeStruct((rows_padded, _LANE), dtype),
        grid=(num_blocks,),
        in_specs=[pl.BlockSpec((block_rows, _LANE), lambda i: (i, 0))],
        out_specs=pl.BlockSpec((block_rows, _LANE), lambda i: (i, 0)),
        compiler_params=pltpu.CompilerParams(
            dimension_semantics=("parallel",),
            # 2 MiB block * (in + out) * 2 buffers = 8 MiB; 32 MiB gives ample
            # headroom and is within every generation's scoped-VMEM budget
            # (v5e default is only 16 MiB, v7x physical VMEM is 64 MiB/TC).
            vmem_limit_bytes=32 * 1024 * 1024,
        ),
    )(x2d)

    return out2d.reshape(-1)[:total].reshape(orig_shape)


if __name__ == "__main__":
    key = jax.random.PRNGKey(0)
    # Small NCHW input consistent with what the module's forward would accept.
    x = jax.random.normal(key, (2, 4, 16, 16), dtype=jnp.float32)

    y = stacked_relu(x)
    y = jax.block_until_ready(y)

    # Sanity check against the pure-JAX reference relu.
    y_ref = jnp.maximum(x, 0.0)
    assert y.shape == x.shape and y.dtype == x.dtype
    assert bool(jnp.allclose(y, y_ref)), "Pallas ReLU mismatch vs reference"

    print("KERNEL_OK")
</pallas_src>

<mosaic_0001>
module attributes {stable_mosaic.version = 11 : i64} {
  func.func @_relu_kernel(%arg0: i32, %arg1: memref<8x512xf32, #tpu.memory_space<vmem>>, %arg2: memref<8x512xf32, #tpu.memory_space<vmem>>) attributes {dimension_semantics = [#tpu.dimension_semantics<parallel>], iteration_bounds = array<i64: 1>, scalar_prefetch = 0 : i64, scratch_operands = 0 : i64, tpu.core_type = #tpu.core_type<tc>, window_params = [{transform_indices = @transform_0, window_bounds = array<i64: 8, 512>}, {transform_indices = @transform_1, window_bounds = array<i64: 8, 512>}]} {
    %c0 = arith.constant 0 : index
    %c0_0 = arith.constant 0 : index
    %0 = vector.load %arg1[%c0, %c0_0] : memref<8x512xf32, #tpu.memory_space<vmem>>, vector<8x512xf32>
    %cst = arith.constant 0.000000e+00 : f32
    %1 = vector.broadcast %cst : f32 to vector<8x512xf32>
    %2 = arith.maximumf %0, %1 : vector<8x512xf32>
    %c0_1 = arith.constant 0 : index
    %c0_2 = arith.constant 0 : index
    %3 = vector.load %arg2[%c0_1, %c0_2] : memref<8x512xf32, #tpu.memory_space<vmem>>, vector<8x512xf32>
    tpu.vector_store %arg2[%c0_1, %c0_2], %2 {strides = array<i32>} : memref<8x512xf32, #tpu.memory_space<vmem>>, vector<8x512xf32>,
    return
  }
  func.func @transform_0(%arg0: i32) -> (i32, i32) {
    %c0_i32 = arith.constant 0 : i32
    %c0_i32_0 = arith.constant 0 : i32
    return %arg0, %c0_i32 : i32, i32
  }
  func.func @transform_1(%arg0: i32) -> (i32, i32) {
    %c0_i32 = arith.constant 0 : i32
    %c0_i32_0 = arith.constant 0 : i32
    return %arg0, %c0_i32 : i32, i32
  }
}

</mosaic_0001>

<bundles_post_ra>
// kernel: tpu_custom_call.1
= control target key start
LH: loop header
LB: loop body
LE: loop exit
PB: predicated region body
PF: predicated region fallthrough
CT: control target
= control target key end

     0   :  { %6 = vsyncpa [#allocation3], 0  ;;  %s124_s0 = inlined_call_operand.hbm [shape: f32[8,512], index: 0, kind: input, shape index: {}]   ;;  %s125_s1 = inlined_call_operand.hbm [shape: f32[8,512], index: 1, kind: output, shape index: {}]  }
   0x1   :  { %7 = vsyncpa [#allocation4], 0  ;;  %s13_s8 = sshll.u32 %s124_s0, 4  ;;  %s106_s9 = smov [#allocation2]   ;;  %s14_s8 = int_to_ptr.hbm [resolvable:$true] %s13_s8 }
   0x2   :  { %s15_s10 = sshll.u32 %s106_s9, 4  ;;  %s16_s10 = int_to_ptr.vmem [resolvable:$true] %s15_s10 }
   0x3   :  { %18 = dma.hbm_to_vmem [thread:$0]  %s14_s8, 512, %s16_s10, [#allocation3]  }
   0x4   :  { %102 = dma.done.wait [#allocation3], 512  }
   0x5   :  { %103 = vsyncadd [#allocation3], 4294966784  ;;  %v23_v0 = vld [vmem:[#allocation2] sm:$0xff]  ;;  %v24_v1 = vld [vmem:[#allocation2 + $0x8] sm:$0xff]  ;;  %s107_s11 = smov [#allocation5]   ;;  %s42_s0 = sshll.u32 %s125_s1, 4  ;;  %s43_s0 = int_to_ptr.hbm [resolvable:$true] %s42_s0 }
   0x6   :  { %v25_v2 = vld [vmem:[#allocation2 + $0x10] sm:$0xff]  ;;  %v27_v3 = vmax.f32 %v23_v0, 0.0  ;;  %v28_v4 = vmax.f32 %v24_v1, 0.0  ;;  %v26_v6 = vld [vmem:[#allocation2 + $0x18] sm:$0xff]  ;;  %s40_s12 = sshll.u32 %s107_s11, 4  ;;  %s41_s12 = int_to_ptr.vmem [resolvable:$true] %s40_s12 }
   0x7   :  { %v29_v5 = vmax.f32 %v25_v2, 0.0  ;;  %v30_v7 = vmax.f32 %v26_v6, 0.0 }
   0x8   :  { %31 = vst [vmem:[#allocation5] sm:$0xff] %v27_v3 }
   0x9   :  { %32 = vst [vmem:[#allocation5 + $0x8] sm:$0xff] %v28_v4 }
   0xa   :  { %33 = vst [vmem:[#allocation5 + $0x10] sm:$0xff] %v29_v5 }
   0xb   :  { %34 = vst [vmem:[#allocation5 + $0x18] sm:$0xff] %v30_v7 }
   0xc   :  { %45 = dma.vmem_to_hbm [thread:$0]  %s41_s12, 512, %s43_s0, [#allocation4]  }
   0xd   :  { %104 = dma.done.wait [#allocation4], 512  }
   0xe   :  { %105 = vsyncadd [#allocation4], 4294966784 }
   0xf   :  { %50 = vsyncpa [#allocation3], 1 }
  0x10   :  { %51 = vsyncpa [#allocation4], 1 }

</bundles_post_ra>
